<compile_context>
chip_gen: v6e
topology: v6e:2x2x1
jax: 0.10.0
libtpu: 0.0.40
codegen_flags: <defaults>
</compile_context>

<pallas_src>
import jax
import jax.numpy as jnp
from jax.experimental import pallas as pl
from jax.experimental.pallas import tpu as pltpu


# ---------------------------------------------------------------------------
# MXU path: n > 16 (e.g. the 64x64 feature transform).
# Block of TB batch matrices per grid step; batched dot_general on the MXU.
# ---------------------------------------------------------------------------
def _transform_loss_mxu_kernel(m_ref, o_ref):
    m = m_ref[...]                                   # (TB, n, n), native dtype -> MXU directly
    g = jax.lax.dot_general(                         # G_b = m_b^T m_b, f32 accumulate
        m, m,
        dimension_numbers=(((1,), (1,)), ((0,), (0,))),
        preferred_element_type=jnp.float32,
    )                                                # (TB, n, n) f32
    row = jax.lax.broadcasted_iota(jnp.int32, g.shape, 1)
    col = jax.lax.broadcasted_iota(jnp.int32, g.shape, 2)
    diff = jnp.where(row == col, g - 1.0, g)         # G - I formed directly (no cancellation)
    # Per-batch Frobenius norms, written as a (TB, 1, 1) block (tiny output).
    o_ref[...] = jnp.sqrt(jnp.sum(diff * diff, axis=(1, 2), keepdims=True))


def _transform_loss_mxu(m):
    B, n, _ = m.shape
    # Size TB so the f32 Gram temporary stays around ~2 MiB per step (fits the
    # default scoped VMEM on every generation, incl. v7x's smaller VMEM).
    tb_cap = max(8, min(1024, ((512 * 1024) // (n * n)) // 8 * 8))
    tb = B if B <= tb_cap else tb_cap
    nb = pl.cdiv(B, tb)
    b_pad = nb * tb

    out = pl.pallas_call(
        _transform_loss_mxu_kernel,
        out_shape=jax.ShapeDtypeStruct((b_pad, 1, 1), jnp.float32),
        grid=(nb,),
        in_specs=[pl.BlockSpec((tb, n, n), lambda i: (i, 0, 0))],
        out_specs=pl.BlockSpec((tb, 1, 1), lambda i: (i, 0, 0)),
        compiler_params=pltpu.CompilerParams(
            dimension_semantics=("parallel",),
            vmem_limit_bytes=32 * 1024 * 1024,
        ),
        cost_estimate=pl.CostEstimate(
            flops=2 * B * n * n * n + 4 * B * n * n,
            transcendentals=0,
            bytes_accessed=B * n * n * m.dtype.itemsize + b_pad * 4,
        ),
    )(m)
    # Ragged last block writes garbage norms only at rows >= B; slice them off.
    return jnp.mean(out[:B, 0, 0])


# ---------------------------------------------------------------------------
# VPU path: n <= 16 (e.g. the 3x3 input transform).
# Batch lives on the lane axis; G is built with an unrolled, symmetric VPU loop.
# ---------------------------------------------------------------------------
def _transform_loss_small_n_kernel(x_ref, o_ref):
    # x_ref: (n, n, TB) with x[k, i, b] = m[b, k, i]  (batch on lanes).
    x = x_ref[...].astype(jnp.float32)               # elementwise path stays f32 (v5e-safe)
    n = x.shape[0]
    tb = x.shape[2]
    acc = jnp.zeros((1, tb), jnp.float32)
    for i in range(n):
        # Upper-triangular part of row i of G, all batches at once: (n - i, TB)
        gi = x[0, i:i + 1, :] * x[0, i:, :]
        for k in range(1, n):
            gi = gi + x[k, i:i + 1, :] * x[k, i:, :]
        d = gi[0:1, :] - 1.0                          # diagonal term G_ii - 1
        acc = acc + d * d
        if i + 1 < n:
            off = gi[1:, :]                           # G_ij, j > i (use symmetry: count twice)
            acc = acc + 2.0 * jnp.sum(off * off, axis=0, keepdims=True)
    o_ref[...] = jnp.sqrt(acc)                        # (1, TB) lane-dense per-batch norms


def _transform_loss_small_n(m):
    B, n, _ = m.shape
    x = jnp.transpose(m, (1, 2, 0))                   # (n, n, B): layout plumbing in the wrapper
    lane_cap = 1024                                   # multiple of 128 lanes per block
    tb = B if B <= lane_cap else lane_cap
    nb = pl.cdiv(B, tb)
    b_pad = nb * tb

    out = pl.pallas_call(
        _transform_loss_small_n_kernel,
        out_shape=jax.ShapeDtypeStruct((1, b_pad), jnp.float32),
        grid=(nb,),
        in_specs=[pl.BlockSpec((n, n, tb), lambda i: (0, 0, i))],
        out_specs=pl.BlockSpec((1, tb), lambda i: (0, i)),
        compiler_params=pltpu.CompilerParams(
            dimension_semantics=("parallel",),
            vmem_limit_bytes=32 * 1024 * 1024,
        ),
        cost_estimate=pl.CostEstimate(
            flops=B * n * n * (n + 3),
            transcendentals=0,
            bytes_accessed=B * n * n * m.dtype.itemsize + b_pad * 4,
        ),
    )(x)
    return jnp.mean(out[0, :B])


# ---------------------------------------------------------------------------
# Public entry point (forward semantics of PyTorch TransformLoss).
# ---------------------------------------------------------------------------
def transform_loss(m):
    """m: (B, n, n), any float dtype. Returns scalar f32 mean_b ||m_b^T m_b - I||_F."""
    B, n, n2 = m.shape
    assert n == n2, "transform matrices must be square"
    if n <= 16:
        return _transform_loss_small_n(m)
    return _transform_loss_mxu(m)


# ---------------------------------------------------------------------------
# Pure-JAX reference (PyTorch semantics) for the sanity check.
# ---------------------------------------------------------------------------
def _reference_loss(m):
    m32 = m.astype(jnp.float32)
    n = m.shape[-1]
    g = jnp.einsum("bki,bkj->bij", m32, m32, precision=jax.lax.Precision.HIGHEST)
    d = (g - jnp.eye(n, dtype=jnp.float32)).reshape(m.shape[0], -1)
    return jnp.mean(jnp.sqrt(jnp.sum(d * d, axis=-1)))


if __name__ == "__main__":
    key = jax.random.PRNGKey(0)
    k1, k2 = jax.random.split(key)

    # Small-n case (PointNet 3x3 input transform) -> batch-on-lanes VPU kernel.
    m_small = jax.random.normal(k1, (4, 3, 3), dtype=jnp.float32)
    loss_small = transform_loss(m_small)
    jax.block_until_ready(loss_small)
    ref_small = _reference_loss(m_small)
    assert jnp.allclose(loss_small, ref_small, rtol=1e-3, atol=1e-3), (loss_small, ref_small)

    # Larger-n case (64x64 feature transform), bf16 operands fed straight to the MXU.
    m_large = jax.random.normal(k2, (4, 64, 64), dtype=jnp.float32).astype(jnp.bfloat16)
    loss_large = transform_loss(m_large)
    jax.block_until_ready(loss_large)
    ref_large = _reference_loss(m_large)
    assert jnp.allclose(loss_large, ref_large, rtol=2e-3, atol=1e-2), (loss_large, ref_large)

    print("KERNEL_OK")
</pallas_src>

<mosaic_0001>
module attributes {stable_mosaic.version = 11 : i64} {
  func.func @_transform_loss_small_n_kernel(%arg0: i32, %arg1: memref<3x3x4xf32, #tpu.memory_space<vmem>>, %arg2: memref<1x4xf32, #tpu.memory_space<vmem>>) attributes {dimension_semantics = [#tpu.dimension_semantics<parallel>], iteration_bounds = array<i64: 1>, scalar_prefetch = 0 : i64, scratch_operands = 0 : i64, tpu.core_type = #tpu.core_type<tc>, window_params = [{transform_indices = @transform_0, window_bounds = array<i64: 3, 3, 4>}, {transform_indices = @transform_1, window_bounds = array<i64: 1, 4>}]} {
    %c0 = arith.constant 0 : index
    %c0_0 = arith.constant 0 : index
    %c0_1 = arith.constant 0 : index
    %0 = vector.load %arg1[%c0, %c0_0, %c0_1] : memref<3x3x4xf32, #tpu.memory_space<vmem>>, vector<3x3x4xf32>
    %cst = arith.constant 0.000000e+00 : f32
    %1 = vector.broadcast %cst : f32 to vector<1x4xf32>
    %2 = vector.extract_strided_slice %0 {offsets = [0, 0, 0], sizes = [1, 1, 4], strides = [1, 1, 1]} : vector<3x3x4xf32> to vector<1x1x4xf32>
    %3 = vector.shape_cast %2 : vector<1x1x4xf32> to vector<1x4xf32>
    %4 = vector.extract_strided_slice %0 {offsets = [0, 0, 0], sizes = [1, 3, 4], strides = [1, 1, 1]} : vector<3x3x4xf32> to vector<1x3x4xf32>
    %5 = vector.shape_cast %4 : vector<1x3x4xf32> to vector<3x4xf32>
    %6 = vector.broadcast %3 : vector<1x4xf32> to vector<3x4xf32>
    %7 = arith.mulf %6, %5 : vector<3x4xf32>
    %8 = vector.extract_strided_slice %0 {offsets = [1, 0, 0], sizes = [1, 1, 4], strides = [1, 1, 1]} : vector<3x3x4xf32> to vector<1x1x4xf32>
    %9 = vector.shape_cast %8 : vector<1x1x4xf32> to vector<1x4xf32>
    %10 = vector.extract_strided_slice %0 {offsets = [1, 0, 0], sizes = [1, 3, 4], strides = [1, 1, 1]} : vector<3x3x4xf32> to vector<1x3x4xf32>
    %11 = vector.shape_cast %10 : vector<1x3x4xf32> to vector<3x4xf32>
    %12 = vector.broadcast %9 : vector<1x4xf32> to vector<3x4xf32>
    %13 = arith.mulf %12, %11 : vector<3x4xf32>
    %14 = arith.addf %7, %13 : vector<3x4xf32>
    %15 = vector.extract_strided_slice %0 {offsets = [2, 0, 0], sizes = [1, 1, 4], strides = [1, 1, 1]} : vector<3x3x4xf32> to vector<1x1x4xf32>
    %16 = vector.shape_cast %15 : vector<1x1x4xf32> to vector<1x4xf32>
    %17 = vector.extract_strided_slice %0 {offsets = [2, 0, 0], sizes = [1, 3, 4], strides = [1, 1, 1]} : vector<3x3x4xf32> to vector<1x3x4xf32>
    %18 = vector.shape_cast %17 : vector<1x3x4xf32> to vector<3x4xf32>
    %19 = vector.broadcast %16 : vector<1x4xf32> to vector<3x4xf32>
    %20 = arith.mulf %19, %18 : vector<3x4xf32>
    %21 = arith.addf %14, %20 : vector<3x4xf32>
    %22 = vector.extract_strided_slice %21 {offsets = [0, 0], sizes = [1, 4], strides = [1, 1]} : vector<3x4xf32> to vector<1x4xf32>
    %cst_2 = arith.constant 1.000000e+00 : f32
    %23 = vector.broadcast %cst_2 : f32 to vector<1x4xf32>
    %24 = arith.subf %22, %23 : vector<1x4xf32>
    %25 = arith.mulf %24, %24 : vector<1x4xf32>
    %26 = arith.addf %1, %25 : vector<1x4xf32>
    %27 = vector.extract_strided_slice %21 {offsets = [1, 0], sizes = [2, 4], strides = [1, 1]} : vector<3x4xf32> to vector<2x4xf32>
    %28 = arith.mulf %27, %27 : vector<2x4xf32>
    %cst_3 = arith.constant dense<0.000000e+00> : vector<4xf32>
    %29 = vector.multi_reduction <add>, %28, %cst_3 [0] : vector<2x4xf32> to vector<4xf32>
    %30 = vector.shape_cast %29 : vector<4xf32> to vector<1x4xf32>
    %cst_4 = arith.constant 2.000000e+00 : f32
    %31 = vector.broadcast %cst_4 : f32 to vector<1x4xf32>
    %32 = arith.mulf %31, %30 : vector<1x4xf32>
    %33 = arith.addf %26, %32 : vector<1x4xf32>
    %34 = vector.extract_strided_slice %0 {offsets = [0, 1, 0], sizes = [1, 1, 4], strides = [1, 1, 1]} : vector<3x3x4xf32> to vector<1x1x4xf32>
    %35 = vector.shape_cast %34 : vector<1x1x4xf32> to vector<1x4xf32>
    %36 = vector.extract_strided_slice %0 {offsets = [0, 1, 0], sizes = [1, 2, 4], strides = [1, 1, 1]} : vector<3x3x4xf32> to vector<1x2x4xf32>
    %37 = vector.shape_cast %36 : vector<1x2x4xf32> to vector<2x4xf32>
    %38 = vector.broadcast %35 : vector<1x4xf32> to vector<2x4xf32>
    %39 = arith.mulf %38, %37 : vector<2x4xf32>
    %40 = vector.extract_strided_slice %0 {offsets = [1, 1, 0], sizes = [1, 1, 4], strides = [1, 1, 1]} : vector<3x3x4xf32> to vector<1x1x4xf32>
    %41 = vector.shape_cast %40 : vector<1x1x4xf32> to vector<1x4xf32>
    %42 = vector.extract_strided_slice %0 {offsets = [1, 1, 0], sizes = [1, 2, 4], strides = [1, 1, 1]} : vector<3x3x4xf32> to vector<1x2x4xf32>
    %43 = vector.shape_cast %42 : vector<1x2x4xf32> to vector<2x4xf32>
    %44 = vector.broadcast %41 : vector<1x4xf32> to vector<2x4xf32>
    %45 = arith.mulf %44, %43 : vector<2x4xf32>
    %46 = arith.addf %39, %45 : vector<2x4xf32>
    %47 = vector.extract_strided_slice %0 {offsets = [2, 1, 0], sizes = [1, 1, 4], strides = [1, 1, 1]} : vector<3x3x4xf32> to vector<1x1x4xf32>
    %48 = vector.shape_cast %47 : vector<1x1x4xf32> to vector<1x4xf32>
    %49 = vector.extract_strided_slice %0 {offsets = [2, 1, 0], sizes = [1, 2, 4], strides = [1, 1, 1]} : vector<3x3x4xf32> to vector<1x2x4xf32>
    %50 = vector.shape_cast %49 : vector<1x2x4xf32> to vector<2x4xf32>
    %51 = vector.broadcast %48 : vector<1x4xf32> to vector<2x4xf32>
    %52 = arith.mulf %51, %50 : vector<2x4xf32>
    %53 = arith.addf %46, %52 : vector<2x4xf32>
    %54 = vector.extract_strided_slice %53 {offsets = [0, 0], sizes = [1, 4], strides = [1, 1]} : vector<2x4xf32> to vector<1x4xf32>
    %cst_5 = arith.constant 1.000000e+00 : f32
    %55 = vector.broadcast %cst_5 : f32 to vector<1x4xf32>
    %56 = arith.subf %54, %55 : vector<1x4xf32>
    %57 = arith.mulf %56, %56 : vector<1x4xf32>
    %58 = arith.addf %33, %57 : vector<1x4xf32>
    %59 = vector.extract_strided_slice %53 {offsets = [1, 0], sizes = [1, 4], strides = [1, 1]} : vector<2x4xf32> to vector<1x4xf32>
    %60 = arith.mulf %59, %59 : vector<1x4xf32>
    %cst_6 = arith.constant dense<0.000000e+00> : vector<4xf32>
    %61 = vector.multi_reduction <add>, %60, %cst_6 [0] : vector<1x4xf32> to vector<4xf32>
    %62 = vector.shape_cast %61 : vector<4xf32> to vector<1x4xf32>
    %cst_7 = arith.constant 2.000000e+00 : f32
    %63 = vector.broadcast %cst_7 : f32 to vector<1x4xf32>
    %64 = arith.mulf %63, %62 : vector<1x4xf32>
    %65 = arith.addf %58, %64 : vector<1x4xf32>
    %66 = vector.extract_strided_slice %0 {offsets = [0, 2, 0], sizes = [1, 1, 4], strides = [1, 1, 1]} : vector<3x3x4xf32> to vector<1x1x4xf32>
    %67 = vector.shape_cast %66 : vector<1x1x4xf32> to vector<1x4xf32>
    %68 = vector.extract_strided_slice %0 {offsets = [0, 2, 0], sizes = [1, 1, 4], strides = [1, 1, 1]} : vector<3x3x4xf32> to vector<1x1x4xf32>
    %69 = vector.shape_cast %68 : vector<1x1x4xf32> to vector<1x4xf32>
    %70 = arith.mulf %67, %69 : vector<1x4xf32>
    %71 = vector.extract_strided_slice %0 {offsets = [1, 2, 0], sizes = [1, 1, 4], strides = [1, 1, 1]} : vector<3x3x4xf32> to vector<1x1x4xf32>
    %72 = vector.shape_cast %71 : vector<1x1x4xf32> to vector<1x4xf32>
    %73 = vector.extract_strided_slice %0 {offsets = [1, 2, 0], sizes = [1, 1, 4], strides = [1, 1, 1]} : vector<3x3x4xf32> to vector<1x1x4xf32>
    %74 = vector.shape_cast %73 : vector<1x1x4xf32> to vector<1x4xf32>
    %75 = arith.mulf %72, %74 : vector<1x4xf32>
    %76 = arith.addf %70, %75 : vector<1x4xf32>
    %77 = vector.extract_strided_slice %0 {offsets = [2, 2, 0], sizes = [1, 1, 4], strides = [1, 1, 1]} : vector<3x3x4xf32> to vector<1x1x4xf32>
    %78 = vector.shape_cast %77 : vector<1x1x4xf32> to vector<1x4xf32>
    %79 = vector.extract_strided_slice %0 {offsets = [2, 2, 0], sizes = [1, 1, 4], strides = [1, 1, 1]} : vector<3x3x4xf32> to vector<1x1x4xf32>
    %80 = vector.shape_cast %79 : vector<1x1x4xf32> to vector<1x4xf32>
    %81 = arith.mulf %78, %80 : vector<1x4xf32>
    %82 = arith.addf %76, %81 : vector<1x4xf32>
    %cst_8 = arith.constant 1.000000e+00 : f32
    %83 = vector.broadcast %cst_8 : f32 to vector<1x4xf32>
    %84 = arith.subf %82, %83 : vector<1x4xf32>
    %85 = arith.mulf %84, %84 : vector<1x4xf32>
    %86 = arith.addf %65, %85 : vector<1x4xf32>
    %87 = math.sqrt %86 : vector<1x4xf32>
    %c0_9 = arith.constant 0 : index
    %c0_10 = arith.constant 0 : index
    %88 = vector.load %arg2[%c0_9, %c0_10] : memref<1x4xf32, #tpu.memory_space<vmem>>, vector<1x4xf32>
    tpu.vector_store %arg2[%c0_9, %c0_10], %87 {strides = array<i32>} : memref<1x4xf32, #tpu.memory_space<vmem>>, vector<1x4xf32>,
    return
  }
  func.func @transform_0(%arg0: i32) -> (i32, i32, i32) {
    %c0_i32 = arith.constant 0 : i32
    %c0_i32_0 = arith.constant 0 : i32
    %c0_i32_1 = arith.constant 0 : i32
    return %c0_i32, %c0_i32_0, %arg0 : i32, i32, i32
  }
  func.func @transform_1(%arg0: i32) -> (i32, i32) {
    %c0_i32 = arith.constant 0 : i32
    %c0_i32_0 = arith.constant 0 : i32
    return %c0_i32, %arg0 : i32, i32
  }
}

</mosaic_0001>

<bundles_post_ra>
// kernel: tpu_custom_call.1
= control target key start
LH: loop header
LB: loop body
LE: loop exit
PB: predicated region body
PF: predicated region fallthrough
CT: control target
= control target key end

     0   :  { %6 = vsyncpa [#allocation3], 0  ;;  %s198_s0 = inlined_call_operand.hbm [shape: f32[3,3,4], index: 0, kind: input, shape index: {}]   ;;  %s199_s1 = inlined_call_operand.hbm [shape: f32[1,4], index: 1, kind: output, shape index: {}]  }
   0x1   :  { %7 = vsyncpa [#allocation4], 0  ;;  %s178_s6 = smov [#allocation2]  }
   0x2   :  { %s13_s7 = sshll.u32 %s178_s6, 4  ;;  %s14_s7 = int_to_ptr.vmem [resolvable:$true] %s13_s7 }
   0x3   :  { %s142_s8 = scalar_lea.vmem %s14_s7, 192  ;;  %p147_p1 = scmp.lt.s32.totalorder %s14_s7, %s14_s7 }
   0x4   :  { %p143_p0 = scmp.ne.s32.totalorder %s14_s7, %s142_s8  ;;  %p148_p2 = scmp.lt.s32.totalorder %s142_s8, %s142_s8 }
   0x6   :  { %p149_p3 = por %p148_p2, %p147_p1 }
   0x8   :  { %p150_p4 = pnand %p149_p3, %p143_p0 }
   0xa   :  { %153 = shalt.err (!%p150_p4)
}
   0xb   :  { %s179_s9 = smov 64   ;;  %s180_s10 = smov 4  }
   0xc   :  { %19 = dma.hbm_to_vmem [thread:$0]  %s198_s0, 192, %s14_s7, [#allocation3], %s179_s9, %s179_s9, %s180_s10  }
   0xd   :  { %174 = dma.done.wait [#allocation3], 192  }
   0xe   :  { %175 = vsyncadd [#allocation3], 4294967104  ;;  %v26_v0 = vlaneseq  ;;  %v23_v4 = vld [vmem:[#allocation2] sm:$0x7]  ;;  %v24_v5 = vld [vmem:[#allocation2 + $0x4] sm:$0x7] }
   0xf   :  { %v25_v6 = vld [vmem:[#allocation2 + $0x8] sm:$0x7]  ;;  %vm50_vm0 = vcmask 25600   ;;  %v90_v23 = vmul.f32 %v23_v4, %v23_v4  ;;  %v91_v24 = vmul.f32 %v24_v5, %v24_v5  ;;  %s181_s0 = smov [#allocation5]   ;;  %vm108_vm3 = vcmask 24576  }
  0x10   :  { %v27_v1 = vshrl.u32 %v26_v0, 7  ;;  %v93_v30 = vmul.f32 %v25_v6, %v25_v6  ;;  %s116_s13 = sshll.u32 %s181_s0, 4  ;;  %s117_s13 = int_to_ptr.vmem [resolvable:$true] %s116_s13 }
  0x11   :  { %v92_v29 = vadd.f32 %v91_v24, %v90_v23  ;;  %s154_s14 = scalar_lea.vmem %s117_s13, 16  ;;  %s158_s15 = scalar_lea.vmem %s117_s13, 32 }
  0x12   :  { %v28_v2 = vsub.s32 0, %v27_v1  ;;  %v62_v3 = vsub.s32 1, %v27_v1  ;;  %p155_p5 = scmp.ne.s32.totalorder %s117_s13, %s154_s14  ;;  %p159_p6 = scmp.lt.s32.totalorder %s117_s13, %s117_s13 }
  0x13   :  { %v94_v34 = vadd.f32 %v93_v30, %v92_v29  ;;  %p160_p7 = scmp.lt.s32.totalorder %s158_s15, %s154_s14 }
  0x14   :  { %v29_v7 = vrot.slane %v23_v4, %v28_v2  ;;  %v34_v8 = vrot.slane %v24_v5, %v28_v2  ;;  %v40_v9 = vrot.slane %v25_v6, %v28_v2  ;;  %v63_v10 = vrot.slane %v23_v4, %v62_v3 }
  0x15   :  { %v68_v11 = vrot.slane %v24_v5, %v62_v3  ;;  %v74_v18 = vrot.slane %v25_v6, %v62_v3  ;;  %v127_v40 = vadd.f32 -1.0, %v94_v34  ;;  %p161_p8 = por %p160_p7, %p159_p6 }
  0x16   :  { %v30_v12 = vmul.f32 %v29_v7, %v23_v4  ;;  %v35_v13 = vmul.f32 %v34_v8, %v24_v5  ;;  %v41_v14 = vmul.f32 %v40_v9, %v25_v6  ;;  %v64_v16 = vmul.f32 %v63_v10, %v23_v4 }
  0x17   :  { %v69_v17 = vmul.f32 %v68_v11, %v24_v5  ;;  %v75_v22 = vmul.f32 %v74_v18, %v25_v6  ;;  %v96_v46 = vmul.f32 %v127_v40, %v127_v40  ;;  %p162_p9 = pnand %p161_p8, %p155_p5 }
  0x18   :  { %v36_v15 = vadd.f32 %v35_v13, %v30_v12 }
  0x19   :  { %v70_v21 = vadd.f32 %v69_v17, %v64_v16  ;;  %v98_v50 = vrot.slane %v96_v46, 2 }
  0x1a   :  { %v42_v19 = vadd.f32 %v41_v14, %v36_v15 }
  0x1b   :  { %v76_v28 = vadd.f32 %v75_v22, %v70_v21 }
  0x1c   :  { %v46_v20 = vmul.f32 %v42_v19, %v42_v19  ;;  %v125_v35 = vadd.f32 -1.0, %v42_v19 }
  0x1d   :  { %v126_v33 = vadd.f32 -1.0, %v76_v28  ;;  %v83_v37 = vmul.f32 %v76_v28, %v76_v28 }
  0x1e   :  { %v48_v25 = vrot.slane %v46_v20, 1  ;;  %v44_v41 = vmul.f32 %v125_v35, %v125_v35 }
  0x1f   :  { %v78_v39 = vmul.f32 %v126_v33, %v126_v33  ;;  %v85_v43 = vmul.f32 2.0, %v83_v37 }
  0x20   :  { %v51_v26 = vsel %vm50_vm0, %v48_v25, 0.0 }
  0x21   :  { %v52_v27 = vrot.slane %v51_v26, 4  ;;  %v80_v45 = vrot.slane %v78_v39, 1  ;;  %v87_v48 = vrot.slane %v85_v43, 2 }
  0x23   :  { %v53_v31 = vadd.f32 %v52_v27, %v51_v26 }
  0x25   :  { %v54_v32 = vrot.slane %v53_v31, 2 }
  0x27   :  { %v55_v36 = vadd.f32 %v54_v32, %v53_v31 }
  0x29   :  { %v56_v38 = vrot.slane %v55_v36, 1 }
  0x2b   :  { %v57_v42 = vadd.f32 %v56_v38, %v55_v36 }
  0x2d   :  { %v58_v44 = vmul.f32 2.0, %v57_v42 }
  0x2f   :  { %v59_v47 = vadd.f32 %v58_v44, %v44_v41 }
  0x31   :  { %v82_v49 = vadd.f32 %v80_v45, %v59_v47 }
  0x33   :  { %v89_v51 = vadd.f32 %v87_v48, %v82_v49 }
  0x35   :  { %v100_v52 = vadd.f32 %v98_v50, %v89_v51 }
  0x37   :  { %132 = vrsqrt.f32 %v100_v52  ;;  %vm103_vm1 = vcmp.eq.f32.partialorder %v100_v52, inf  ;;  %v106_v54 = vand.u32 2147483648, %v100_v52  ;;  %vm105_vm2 = vcmp.eq.f32.partialorder %v100_v52, 0.0 }
  0x44   :  { %v133_v53 = vpop.eup %132 }
  0x45   :  { %v102_v55 = vmul.f32 %v133_v53, %v100_v52 }
  0x47   :  { %v104_v56 = vsel %vm103_vm1, %v100_v52, %v102_v55 }
  0x48   :  { %v107_v57 = vsel %vm105_vm2, %v106_v54, %v104_v56 }
  0x49   :  { %109 = vst.msk [vmem:[#allocation5] sm:$0x1] %vm108_vm3, %v107_v57 }
  0x4a   :  { %165 = shalt.err (!%p162_p9)
}
  0x4b   :  { %119 = dma.vmem_to_hbm [thread:$0]  %s117_s13, 16, %s199_s1, [#allocation4]  }
  0x4c   :  { %176 = dma.done.wait [#allocation4], 16  }
  0x4d   :  { %177 = vsyncadd [#allocation4], 4294967280 }
  0x4e   :  { %123 = vsyncpa [#allocation3], 1 }
  0x4f   :  { %124 = vsyncpa [#allocation4], 1 }

</bundles_post_ra>
